<compile_context>
chip_gen: v5e
topology: v5e:2x2
jax: 0.10.0
libtpu: 0.0.40
codegen_flags: <defaults>
</compile_context>

<pallas_src>
import functools

import jax
import jax.numpy as jnp
from jax import lax
from jax.experimental import pallas as pl
from jax.experimental.pallas import tpu as pltpu

MAX_ALPHA = 0.7
ALPHA_EPS = 0.001


def _info_dropout_layer(h, z, wc_ref, bc_ref, hidden):
    """One InformationDropoutLayer (training mode) on a VMEM-resident activation.

    The mean and alpha Linears are fused into a single wide matmul: columns
    [:hidden] of the result are the mean path, columns [hidden:] the alpha path.
    """
    pre = jnp.dot(h.astype(wc_ref.dtype), wc_ref[...],
                  preferred_element_type=jnp.float32) + bc_ref[...]
    mu = jnp.maximum(pre[:, :hidden], 0.0)                      # activate=True -> ReLU
    alpha = ALPHA_EPS + MAX_ALPHA * jax.nn.sigmoid(pre[:, hidden:])
    noise = jnp.exp(alpha * z)                                  # lognormal mult. noise
    # KL(q || log-uniform prior) up to constants: -log(alpha / (max_alpha + eps))
    kl = jnp.sum(-jnp.log(alpha * (1.0 / (MAX_ALPHA + ALPHA_EPS))),
                 axis=-1, keepdims=True)
    return mu * noise, kl


def _model_kernel(hidden, kl_col,
                  x_ref, z1_ref, z2_ref,
                  w1_ref, b1_ref,
                  w2_ref, b2_ref,
                  w3_ref, b3_ref,
                  out_ref):
    x = x_ref[...]
    h1, kl1 = _info_dropout_layer(x, z1_ref[...], w1_ref, b1_ref, hidden)
    h2, kl2 = _info_dropout_layer(h1, z2_ref[...], w2_ref, b2_ref, hidden)

    # Final plain Linear (weights were zero-padded to a lane-dense 128-multiple).
    logits = jnp.dot(h2.astype(w3_ref.dtype), w3_ref[...],
                     preferred_element_type=jnp.float32) + b3_ref[...]

    # Pack kl into column `kl_col` of the padded slab -> one unmasked full store.
    col = lax.broadcasted_iota(jnp.int32, logits.shape, 1)
    out_ref[...] = jnp.where(col == kl_col, kl1 + kl2, logits)


def _batch_tile(b):
    """Largest nice batch tile that divides b (keeps (8,128) block rules happy)."""
    for t in (512, 256, 128, 64, 32, 16, 8):
        if b % t == 0:
            return t
    return b  # tiny / odd batches: a single whole-batch tile (full-dim block is legal)


@jax.jit
def model_inf_dropout_forward(x_nchw, params, noise_key):
    """Training-mode forward of Model_Inf_Dropout: returns (logits, kl)."""
    B = x_nchw.shape[0]
    x_flat = x_nchw.reshape(B, -1).astype(jnp.float32)          # Flatten()

    (w1, b1, wa1, ba1, w2, b2, wa2, ba2, w3, b3) = params
    in_features = w1.shape[0]
    hidden = w1.shape[1]
    out_size = w3.shape[1]

    # Fuse each layer's mean/alpha Linears (host-side concat, done once per call);
    # matmul operands in bf16, biases / accumulation stay f32.
    w1c = jnp.concatenate([w1, wa1], axis=1).astype(jnp.bfloat16)
    b1c = jnp.concatenate([b1, ba1], axis=1).astype(jnp.float32)
    w2c = jnp.concatenate([w2, wa2], axis=1).astype(jnp.bfloat16)
    b2c = jnp.concatenate([b2, ba2], axis=1).astype(jnp.float32)

    # Lane-dense output slab: pad final Linear to a 128-multiple wide enough to
    # also hold the per-row KL in column `out_size`.
    P = ((out_size + 1 + 127) // 128) * 128
    w3p = jnp.pad(w3, ((0, 0), (0, P - out_size))).astype(jnp.bfloat16)
    b3p = jnp.pad(b3, ((0, 0), (0, P - out_size))).astype(jnp.float32)

    # Lognormal noise: draw N(0,1) host-side, apply exp(alpha*z) in-kernel.
    k1, k2 = jax.random.split(noise_key)
    z1 = jax.random.normal(k1, (B, hidden), jnp.float32)
    z2 = jax.random.normal(k2, (B, hidden), jnp.float32)

    tb = _batch_tile(B)
    grid = (B // tb,)

    def row_spec(cols):
        return pl.BlockSpec((tb, cols), lambda i: (i, 0))

    def rep_spec(rows, cols):
        return pl.BlockSpec((rows, cols), lambda i: (0, 0))

    slab = pl.pallas_call(
        functools.partial(_model_kernel, hidden, out_size),
        out_shape=jax.ShapeDtypeStruct((B, P), jnp.float32),
        grid=grid,
        in_specs=[
            row_spec(in_features),                                   # x
            row_spec(hidden),                                        # z1
            row_spec(hidden),                                        # z2
            rep_spec(in_features, 2 * hidden), rep_spec(1, 2 * hidden),  # layer 1 (W|Wa, b|ba)
            rep_spec(hidden, 2 * hidden),      rep_spec(1, 2 * hidden),  # layer 2 (W|Wa, b|ba)
            rep_spec(hidden, P),               rep_spec(1, P),           # final Linear (padded)
        ],
        out_specs=row_spec(P),
        compiler_params=pltpu.CompilerParams(
            dimension_semantics=("parallel",)),   # batch tiles shard across TCs on v7x
    )(x_flat, z1, z2, w1c, b1c, w2c, b2c, w3p, b3p)

    return slab[:, :out_size], slab[:, out_size]


def init_params(key, input_size, hidden_size, output_size):
    """Deterministic PyTorch-style Linear init: U(-1/sqrt(fan_in), 1/sqrt(fan_in))."""
    def linear(k, fan_in, fan_out):
        kw, kb = jax.random.split(k)
        bound = 1.0 / jnp.sqrt(jnp.float32(fan_in))
        w = jax.random.uniform(kw, (fan_in, fan_out), jnp.float32, -bound, bound)
        b = jax.random.uniform(kb, (1, fan_out), jnp.float32, -bound, bound)
        return w, b

    keys = jax.random.split(key, 5)
    w1, b1 = linear(keys[0], input_size, hidden_size)     # layer1 mean
    wa1, ba1 = linear(keys[1], input_size, hidden_size)   # layer1 alpha
    w2, b2 = linear(keys[2], hidden_size, hidden_size)    # layer2 mean
    wa2, ba2 = linear(keys[3], hidden_size, hidden_size)  # layer2 alpha
    w3, b3 = linear(keys[4], hidden_size, output_size)    # final Linear
    return (w1, b1, wa1, ba1, w2, b2, wa2, ba2, w3, b3)


if __name__ == "__main__":
    # Small shapes: input NCHW (2, 4, 4, 4) -> flatten -> 64 features.
    B, C, H, W = 2, 4, 4, 4
    input_size = C * H * W   # 64
    hidden_size = 32
    output_size = 8

    key = jax.random.PRNGKey(0)
    kx, kp, kn = jax.random.split(key, 3)
    x = jax.random.normal(kx, (B, C, H, W), dtype=jnp.float32)
    params = init_params(kp, input_size, hidden_size, output_size)

    logits, kl = model_inf_dropout_forward(x, params, kn)
    jax.block_until_ready((logits, kl))

    assert logits.shape == (B, output_size)
    assert kl.shape == (B,)
    assert bool(jnp.all(jnp.isfinite(logits))) and bool(jnp.all(jnp.isfinite(kl)))
    assert bool(jnp.all(kl > 0.0))  # KL of info-dropout is strictly positive
    print("KERNEL_OK")
</pallas_src>

<mosaic_0001>
module attributes {stable_mosaic.version = 11 : i64} {
  func.func @_model_kernel(%arg0: i32, %arg1: memref<2x64xf32, #tpu.memory_space<vmem>>, %arg2: memref<2x32xf32, #tpu.memory_space<vmem>>, %arg3: memref<2x32xf32, #tpu.memory_space<vmem>>, %arg4: memref<64x64xbf16, #tpu.memory_space<vmem>>, %arg5: memref<1x64xf32, #tpu.memory_space<vmem>>, %arg6: memref<32x64xbf16, #tpu.memory_space<vmem>>, %arg7: memref<1x64xf32, #tpu.memory_space<vmem>>, %arg8: memref<32x128xbf16, #tpu.memory_space<vmem>>, %arg9: memref<1x128xf32, #tpu.memory_space<vmem>>, %arg10: memref<2x128xf32, #tpu.memory_space<vmem>>) attributes {dimension_semantics = [#tpu.dimension_semantics<parallel>], iteration_bounds = array<i64: 1>, scalar_prefetch = 0 : i64, scratch_operands = 0 : i64, tpu.core_type = #tpu.core_type<tc>, window_params = [{transform_indices = @transform_0, window_bounds = array<i64: 2, 64>}, {transform_indices = @transform_1, window_bounds = array<i64: 2, 32>}, {transform_indices = @transform_2, window_bounds = array<i64: 2, 32>}, {pipeline_mode = #tpu.pipeline_mode<synchronous>, transform_indices = @transform_3, window_bounds = array<i64: 64, 64>}, {pipeline_mode = #tpu.pipeline_mode<synchronous>, transform_indices = @transform_4, window_bounds = array<i64: 1, 64>}, {pipeline_mode = #tpu.pipeline_mode<synchronous>, transform_indices = @transform_5, window_bounds = array<i64: 32, 64>}, {pipeline_mode = #tpu.pipeline_mode<synchronous>, transform_indices = @transform_6, window_bounds = array<i64: 1, 64>}, {pipeline_mode = #tpu.pipeline_mode<synchronous>, transform_indices = @transform_7, window_bounds = array<i64: 32, 128>}, {pipeline_mode = #tpu.pipeline_mode<synchronous>, transform_indices = @transform_8, window_bounds = array<i64: 1, 128>}, {transform_indices = @transform_9, window_bounds = array<i64: 2, 128>}]} {
    %c0 = arith.constant 0 : index
    %c0_0 = arith.constant 0 : index
    %0 = vector.load %arg1[%c0, %c0_0] : memref<2x64xf32, #tpu.memory_space<vmem>>, vector<2x64xf32>
    %c0_1 = arith.constant 0 : index
    %c0_2 = arith.constant 0 : index
    %1 = vector.load %arg2[%c0_1, %c0_2] : memref<2x32xf32, #tpu.memory_space<vmem>>, vector<2x32xf32>
    %2 = arith.truncf %0 : vector<2x64xf32> to vector<2x64xbf16>
    %c0_3 = arith.constant 0 : index
    %c0_4 = arith.constant 0 : index
    %3 = vector.load %arg4[%c0_3, %c0_4] : memref<64x64xbf16, #tpu.memory_space<vmem>>, vector<64x64xbf16>
    %cst = arith.constant dense<0.000000e+00> : vector<2x64xf32>
    %4 = tpu.matmul %2, %3, %cst {dimension_numbers = #tpu.dot_dimension_numbers<[1], [0], [0], [1], [0, 0, 1, 1], [], []>} : vector<2x64xbf16>, vector<64x64xbf16>, vector<2x64xf32> -> vector<2x64xf32>
    %c0_5 = arith.constant 0 : index
    %c0_6 = arith.constant 0 : index
    %5 = vector.load %arg5[%c0_5, %c0_6] : memref<1x64xf32, #tpu.memory_space<vmem>>, vector<1x64xf32>
    %6 = vector.broadcast %5 : vector<1x64xf32> to vector<2x64xf32>
    %7 = arith.addf %4, %6 : vector<2x64xf32>
    %8 = vector.extract_strided_slice %7 {offsets = [0, 0], sizes = [2, 32], strides = [1, 1]} : vector<2x64xf32> to vector<2x32xf32>
    %cst_7 = arith.constant 0.000000e+00 : f32
    %9 = vector.broadcast %cst_7 : f32 to vector<2x32xf32>
    %10 = arith.maximumf %8, %9 : vector<2x32xf32>
    %11 = vector.extract_strided_slice %7 {offsets = [0, 32], sizes = [2, 32], strides = [1, 1]} : vector<2x64xf32> to vector<2x32xf32>
    %12 = arith.negf %11 : vector<2x32xf32>
    %13 = math.exp %12 : vector<2x32xf32>
    %cst_8 = arith.constant 1.000000e+00 : f32
    %14 = vector.broadcast %cst_8 : f32 to vector<2x32xf32>
    %15 = arith.addf %14, %13 : vector<2x32xf32>
    %16 = arith.divf %14, %15 : vector<2x32xf32>
    %cst_9 = arith.constant 0.699999988 : f32
    %17 = vector.broadcast %cst_9 : f32 to vector<2x32xf32>
    %18 = arith.mulf %17, %16 : vector<2x32xf32>
    %cst_10 = arith.constant 1.000000e-03 : f32
    %19 = vector.broadcast %cst_10 : f32 to vector<2x32xf32>
    %20 = arith.addf %19, %18 : vector<2x32xf32>
    %21 = arith.mulf %20, %1 : vector<2x32xf32>
    %22 = math.exp %21 : vector<2x32xf32>
    %cst_11 = arith.constant 1.42653358 : f32
    %23 = vector.broadcast %cst_11 : f32 to vector<2x32xf32>
    %24 = arith.mulf %20, %23 : vector<2x32xf32>
    %25 = math.log %24 : vector<2x32xf32>
    %cst_12 = arith.constant 0.000000e+00 : f32
    %26 = vector.broadcast %cst_12 : f32 to vector<2x32xf32>
    %27 = arith.subf %26, %25 : vector<2x32xf32>
    %cst_13 = arith.constant dense<0.000000e+00> : vector<2xf32>
    %28 = vector.multi_reduction <add>, %27, %cst_13 [1] : vector<2x32xf32> to vector<2xf32>
    %29 = vector.shape_cast %28 : vector<2xf32> to vector<2x1xf32>
    %30 = arith.mulf %10, %22 : vector<2x32xf32>
    %c0_14 = arith.constant 0 : index
    %c0_15 = arith.constant 0 : index
    %31 = vector.load %arg3[%c0_14, %c0_15] : memref<2x32xf32, #tpu.memory_space<vmem>>, vector<2x32xf32>
    %32 = arith.truncf %30 : vector<2x32xf32> to vector<2x32xbf16>
    %c0_16 = arith.constant 0 : index
    %c0_17 = arith.constant 0 : index
    %33 = vector.load %arg6[%c0_16, %c0_17] : memref<32x64xbf16, #tpu.memory_space<vmem>>, vector<32x64xbf16>
    %cst_18 = arith.constant dense<0.000000e+00> : vector<2x64xf32>
    %34 = tpu.matmul %32, %33, %cst_18 {dimension_numbers = #tpu.dot_dimension_numbers<[1], [0], [0], [1], [0, 0, 1, 1], [], []>} : vector<2x32xbf16>, vector<32x64xbf16>, vector<2x64xf32> -> vector<2x64xf32>
    %c0_19 = arith.constant 0 : index
    %c0_20 = arith.constant 0 : index
    %35 = vector.load %arg7[%c0_19, %c0_20] : memref<1x64xf32, #tpu.memory_space<vmem>>, vector<1x64xf32>
    %36 = vector.broadcast %35 : vector<1x64xf32> to vector<2x64xf32>
    %37 = arith.addf %34, %36 : vector<2x64xf32>
    %38 = vector.extract_strided_slice %37 {offsets = [0, 0], sizes = [2, 32], strides = [1, 1]} : vector<2x64xf32> to vector<2x32xf32>
    %cst_21 = arith.constant 0.000000e+00 : f32
    %39 = vector.broadcast %cst_21 : f32 to vector<2x32xf32>
    %40 = arith.maximumf %38, %39 : vector<2x32xf32>
    %41 = vector.extract_strided_slice %37 {offsets = [0, 32], sizes = [2, 32], strides = [1, 1]} : vector<2x64xf32> to vector<2x32xf32>
    %42 = arith.negf %41 : vector<2x32xf32>
    %43 = math.exp %42 : vector<2x32xf32>
    %cst_22 = arith.constant 1.000000e+00 : f32
    %44 = vector.broadcast %cst_22 : f32 to vector<2x32xf32>
    %45 = arith.addf %44, %43 : vector<2x32xf32>
    %46 = arith.divf %44, %45 : vector<2x32xf32>
    %cst_23 = arith.constant 0.699999988 : f32
    %47 = vector.broadcast %cst_23 : f32 to vector<2x32xf32>
    %48 = arith.mulf %47, %46 : vector<2x32xf32>
    %cst_24 = arith.constant 1.000000e-03 : f32
    %49 = vector.broadcast %cst_24 : f32 to vector<2x32xf32>
    %50 = arith.addf %49, %48 : vector<2x32xf32>
    %51 = arith.mulf %50, %31 : vector<2x32xf32>
    %52 = math.exp %51 : vector<2x32xf32>
    %cst_25 = arith.constant 1.42653358 : f32
    %53 = vector.broadcast %cst_25 : f32 to vector<2x32xf32>
    %54 = arith.mulf %50, %53 : vector<2x32xf32>
    %55 = math.log %54 : vector<2x32xf32>
    %cst_26 = arith.constant 0.000000e+00 : f32
    %56 = vector.broadcast %cst_26 : f32 to vector<2x32xf32>
    %57 = arith.subf %56, %55 : vector<2x32xf32>
    %cst_27 = arith.constant dense<0.000000e+00> : vector<2xf32>
    %58 = vector.multi_reduction <add>, %57, %cst_27 [1] : vector<2x32xf32> to vector<2xf32>
    %59 = vector.shape_cast %58 : vector<2xf32> to vector<2x1xf32>
    %60 = arith.mulf %40, %52 : vector<2x32xf32>
    %61 = arith.truncf %60 : vector<2x32xf32> to vector<2x32xbf16>
    %c0_28 = arith.constant 0 : index
    %c0_29 = arith.constant 0 : index
    %62 = vector.load %arg8[%c0_28, %c0_29] : memref<32x128xbf16, #tpu.memory_space<vmem>>, vector<32x128xbf16>
    %cst_30 = arith.constant dense<0.000000e+00> : vector<2x128xf32>
    %63 = tpu.matmul %61, %62, %cst_30 {dimension_numbers = #tpu.dot_dimension_numbers<[1], [0], [0], [1], [0, 0, 1, 1], [], []>} : vector<2x32xbf16>, vector<32x128xbf16>, vector<2x128xf32> -> vector<2x128xf32>
    %c0_31 = arith.constant 0 : index
    %c0_32 = arith.constant 0 : index
    %64 = vector.load %arg9[%c0_31, %c0_32] : memref<1x128xf32, #tpu.memory_space<vmem>>, vector<1x128xf32>
    %65 = vector.broadcast %64 : vector<1x128xf32> to vector<2x128xf32>
    %66 = arith.addf %63, %65 : vector<2x128xf32>
    %67 = tpu.iota {dimensions = array<i32: 1>} : vector<2x128xi32>
    %c8_i32 = arith.constant 8 : i32
    %68 = vector.broadcast %c8_i32 : i32 to vector<2x128xi32>
    %69 = arith.cmpi eq, %67, %68 : vector<2x128xi32>
    %70 = arith.addf %29, %59 : vector<2x1xf32>
    %71 = vector.shape_cast %70 : vector<2x1xf32> to vector<2x1xf32>
    %72 = vector.broadcast %71 : vector<2x1xf32> to vector<2x128xf32>
    %73 = arith.select %69, %72, %66 : vector<2x128xi1>, vector<2x128xf32>
    %c0_33 = arith.constant 0 : index
    %c0_34 = arith.constant 0 : index
    %74 = vector.load %arg10[%c0_33, %c0_34] : memref<2x128xf32, #tpu.memory_space<vmem>>, vector<2x128xf32>
    tpu.vector_store %arg10[%c0_33, %c0_34], %73 {strides = array<i32>} : memref<2x128xf32, #tpu.memory_space<vmem>>, vector<2x128xf32>,
    return
  }
  func.func @transform_0(%arg0: i32) -> (i32, i32) {
    %c0_i32 = arith.constant 0 : i32
    %c0_i32_0 = arith.constant 0 : i32
    return %arg0, %c0_i32 : i32, i32
  }
  func.func @transform_1(%arg0: i32) -> (i32, i32) {
    %c0_i32 = arith.constant 0 : i32
    %c0_i32_0 = arith.constant 0 : i32
    return %arg0, %c0_i32 : i32, i32
  }
  func.func @transform_2(%arg0: i32) -> (i32, i32) {
    %c0_i32 = arith.constant 0 : i32
    %c0_i32_0 = arith.constant 0 : i32
    return %arg0, %c0_i32 : i32, i32
  }
  func.func @transform_3(%arg0: i32) -> (i32, i32) {
    %c0_i32 = arith.constant 0 : i32
    %c0_i32_0 = arith.constant 0 : i32
    %c0_i32_1 = arith.constant 0 : i32
    return %c0_i32, %c0_i32_0 : i32, i32
  }
  func.func @transform_4(%arg0: i32) -> (i32, i32) {
    %c0_i32 = arith.constant 0 : i32
    %c0_i32_0 = arith.constant 0 : i32
    %c0_i32_1 = arith.constant 0 : i32
    return %c0_i32, %c0_i32_0 : i32, i32
  }
  func.func @transform_5(%arg0: i32) -> (i32, i32) {
    %c0_i32 = arith.constant 0 : i32
    %c0_i32_0 = arith.constant 0 : i32
    %c0_i32_1 = arith.constant 0 : i32
    return %c0_i32, %c0_i32_0 : i32, i32
  }
  func.func @transform_6(%arg0: i32) -> (i32, i32) {
    %c0_i32 = arith.constant 0 : i32
    %c0_i32_0 = arith.constant 0 : i32
    %c0_i32_1 = arith.constant 0 : i32
    return %c0_i32, %c0_i32_0 : i32, i32
  }
  func.func @transform_7(%arg0: i32) -> (i32, i32) {
    %c0_i32 = arith.constant 0 : i32
    %c0_i32_0 = arith.constant 0 : i32
    %c0_i32_1 = arith.constant 0 : i32
    return %c0_i32, %c0_i32_0 : i32, i32
  }
  func.func @transform_8(%arg0: i32) -> (i32, i32) {
    %c0_i32 = arith.constant 0 : i32
    %c0_i32_0 = arith.constant 0 : i32
    %c0_i32_1 = arith.constant 0 : i32
    return %c0_i32, %c0_i32_0 : i32, i32
  }
  func.func @transform_9(%arg0: i32) -> (i32, i32) {
    %c0_i32 = arith.constant 0 : i32
    %c0_i32_0 = arith.constant 0 : i32
    return %arg0, %c0_i32 : i32, i32
  }
}

</mosaic_0001>

<bundles_post_ra>
// kernel: model_inf_dropout_forward.3
= control target key start
LH: loop header
LB: loop body
LE: loop exit
PB: predicated region body
PF: predicated region fallthrough
CT: control target
= control target key end

     0   :  { %s332_s15 = smov 32   ;;  %vm72_vm0 = vcmask 523264   ;;  %vm126_vm5 = vcmask 254976   ;;  %vm157_vm6 = vcmask 261120   ;;  %s439_s3 = inlined_call_operand.vmem [shape: bf16[64,64], index: 3, kind: input, shape index: {}]   ;;  %s440_s1 = inlined_call_operand.vmem [shape: f32[2,32], index: 1, kind: input, shape index: {}]   ;;  %s441_s4 = inlined_call_operand.vmem [shape: f32[1,64], index: 4, kind: input, shape index: {}]   ;;  %s442_s0 = inlined_call_operand.vmem [shape: f32[2,64], index: 0, kind: input, shape index: {}]   ;;  %s443_s5 = inlined_call_operand.vmem [shape: bf16[32,64], index: 5, kind: input, shape index: {}]   ;;  %s444_s6 = inlined_call_operand.vmem [shape: f32[1,64], index: 6, kind: input, shape index: {}]   ;;  %s445_s2 = inlined_call_operand.vmem [shape: f32[2,32], index: 2, kind: input, shape index: {}]   ;;  %s446_s7 = inlined_call_operand.vmem [shape: bf16[32,128], index: 7, kind: input, shape index: {}]   ;;  %s447_s8 = inlined_call_operand.vmem [shape: f32[1,128], index: 8, kind: input, shape index: {}]   ;;  %s448_s9 = inlined_call_operand.vmem [shape: f32[2,128], index: 9, kind: output, shape index: {}]  }
   0x1   :  { %v306_v0 = vld [vmem:[%s439_s3 + $0x18] sm:$0xff]  ;;  %v34_v1 = vld [vmem:[%s440_s1] sm:$0x3]  ;;  %v305_v2 = vld [vmem:[%s439_s3 + $0x10] sm:$0xff] }
   0x2   :  { %80 = vmatpush.bf16.msra.mxu0 %v306_v0  ;;  %112 = vrot.lane.b32.xlu0 %v34_v1, %s332_s15  ;;  %v304_v3 = vld [vmem:[%s439_s3 + $0x8] sm:$0xff]  ;;  %v303_v4 = vld [vmem:[%s439_s3] sm:$0xff] }
   0x3   :  { %v33_v5 = vld [vmem:[%s442_s0] sm:$0x3]  ;;  %s333_s0 = smov 96   ;;  %v308_v34 = vld [vmem:[%s443_s5 + $0x8] sm:$0xff] }
   0x4   :  { %v35_v6 = vpack.c.bf16 %v33_v5, %v33_v5  ;;  %v313_v7 = vld [vmem:[%s441_s4] ss:$0 sm:$0xff]  ;;  %167 = vmatpush.bf16.msra.mxu1 %v308_v34 }
   0x5   :  { %v307_v35 = vld [vmem:[%s443_s5] sm:$0xff] }
   0x6   :  { %81 = vmatpush.bf16.msra.mxu0 %v305_v2  ;;  %v135_v36 = vld [vmem:[%s445_s2] sm:$0x3] }
   0x7   :  { %197 = vrot.lane.b32.xlu1 %v135_v36, %s332_s15  ;;  %v314_v43 = vld [vmem:[%s444_s6] ss:$0 sm:$0xff] }
   0x8   :  { %168 = vmatpush.bf16.msra.mxu1 %v307_v35 }
   0xa   :  { %82 = vmatpush.bf16.msra.mxu0 %v304_v3 }
   0xe   :  { %83 = vmatpush.bf16.msra.mxu0 %v303_v4 }
  0x11   :  { %282 = vmatmul.msk.bf16.vlgmr.msra.gmra.mxu0 %vm72_vm0, %v35_v6  ;;  %v310_v6 = vld [vmem:[%s446_s7 + $0x8] sm:$0xff] }
  0x12   :  { %249 = vmatpush.bf16.msra.mxu2 %v310_v6 }
  0x74   :  { %v113_v25 = vpop.permute.xlu0 %112 }
  0x79   :  { %v198_v61 = vpop.permute.xlu1 %197 }
  0x8e   :  { %v85_v8 = vpop.f32.mrf.mxu0 }
  0x8f   :  { %v86_v9 = vadd.f32 %v313_v7, %v85_v8  ;;  %v309_v7 = vld [vmem:[%s446_s7] sm:$0xff] }
  0x90   :  { %250 = vmatpush.bf16.msra.mxu2 %v309_v7 }
  0x91   :  { %v283_v10 = vmul.f32 -1.442695, %v86_v9  ;;  %v89_v39 = vmax.f32 %v86_v9, 0.0 }
  0x93   :  { %316 = vpow2.f32 %v283_v10 }
  0x96   :  { %v87_v11 = vpop.f32.mrf.mxu0 }
  0x99   :  { %v317_v12 = vpop.eup %316 }
  0x9a   :  { %v93_v13 = vadd.f32 1.0, %v317_v12 }
  0x9c   :  { %318 = vrcp.f32 %v93_v13  ;;  %v105_v17 = vand.u32 2147483648, %v93_v13  ;;  %v103_v19 = vand.u32 2147483647, %v93_v13  ;;  %vm99_vm2 = vweird.f32 %v93_v13 }
  0x9e   :  { %v106_v21 = vor.u32 1.1754944e-38, %v105_v17  ;;  %vm104_vm4 = vcmp.eq.f32.partialorder %v103_v19, 8.507059e+37 }
  0xa2   :  { %v319_v14 = vpop.eup %318 }
  0xa3   :  { %v95_v15 = vmul.f32 %v319_v14, %v93_v13  ;;  %vm100_vm1 = vweird.f32 %v319_v14 }
  0xa4   :  { %vm101_vm3 = vmor %vm99_vm2, %vm100_vm1 }
  0xa5   :  { %v96_v16 = vsub.f32 1.0, %v95_v15 }
  0xa7   :  { %v97_v18 = vmul.f32 %v319_v14, %v96_v16  ;;  %v315_v16 = vld [vmem:[%s447_s8] ss:$0 sm:$0xff] }
  0xa9   :  { %v98_v20 = vadd.f32 %v319_v14, %v97_v18 }
  0xab   :  { %v102_v22 = vsel %vm101_vm3, %v319_v14, %v98_v20  ;;  %v256_v14 = vlaneseq }
  0xac   :  { %v107_v23 = vsel %vm104_vm4, %v106_v21, %v102_v22 }
  0xad   :  { %v109_v24 = vmul.f32 0.7, %v107_v23  ;;  %v257_v15 = vand.u32 127, %v256_v14 }
  0xaf   :  { %v110_v26 = vadd.f32 0.001, %v109_v24  ;;  %vm258_vm11 = vcmp.eq.s32.totalorder %v257_v15, 8 }
  0xb1   :  { %v115_v27 = vmul.f32 %v113_v25, %v110_v26  ;;  %v118_v28 = vmul.f32 1.4265336, %v110_v26 }
  0xb3   :  { %v116_v29 = vmul.f32 1.442695, %v115_v27  ;;  %320 = vlog2.f32 %v118_v28 }
  0xb5   :  { %322 = vpow2.f32 %v116_v29 }
  0xb9   :  { %v321_v30 = vpop.eup %320 }
  0xba   :  { %v120_v31 = vmul.f32 0.6931472, %v321_v30 }
  0xbb   :  { %v323_v32 = vpop.eup %322 }
  0xbc   :  { %131 = vrot.lane.b32.xlu0 %v323_v32, %s333_s0  ;;  %v121_v33 = vsub.f32 0.0, %v120_v31 }
  0xbe   :  { %123 = vrot.lane.b32.xlu2 %v121_v33, %s333_s0 }
 0x118   :  { %v124_v37 = vpop.permute.xlu2 %123 }
 0x119   :  { %v127_v38 = vsel %vm126_vm5, %v124_v37, 0.0 }
 0x11a   :  { %128 = vadd.xlane.f32.xlu0 %v127_v38 }
 0x12e   :  { %v132_v40 = vpop.permute.xlu0 %131 }
 0x12f   :  { %v134_v41 = vmul.f32 %v132_v40, %v89_v39 }
 0x131   :  { %v136_v42 = vpack.c.bf16 %v134_v41, %v134_v41 }
 0x133   :  { %292 = vmatmul.msk.bf16.vlgmr.msra.gmra.mxu1 %vm157_vm6, %v136_v42 }
 0x18d   :  { %v129_v18 = vpop.xlane.xlu0 %128 }
 0x1b0   :  { %v170_v44 = vpop.f32.mrf.mxu1 }
 0x1b1   :  { %v171_v45 = vadd.f32 %v314_v43, %v170_v44 }
 0x1b3   :  { %v293_v46 = vmul.f32 -1.442695, %v171_v45  ;;  %v174_v10 = vmax.f32 %v171_v45, 0.0 }
 0x1b5   :  { %324 = vpow2.f32 %v293_v46 }
 0x1b8   :  { %v172_v47 = vpop.f32.mrf.mxu1 }
 0x1bb   :  { %v325_v48 = vpop.eup %324 }
 0x1bc   :  { %v178_v49 = vadd.f32 1.0, %v325_v48 }
 0x1be   :  { %326 = vrcp.f32 %v178_v49  ;;  %v190_v53 = vand.u32 2147483648, %v178_v49  ;;  %v188_v55 = vand.u32 2147483647, %v178_v49  ;;  %vm184_vm8 = vweird.f32 %v178_v49 }
 0x1c0   :  { %v191_v57 = vor.u32 1.1754944e-38, %v190_v53  ;;  %vm189_vm10 = vcmp.eq.f32.partialorder %v188_v55, 8.507059e+37 }
 0x1c4   :  { %v327_v50 = vpop.eup %326 }
 0x1c5   :  { %v180_v51 = vmul.f32 %v327_v50, %v178_v49  ;;  %vm185_vm7 = vweird.f32 %v327_v50 }
 0x1c6   :  { %vm186_vm9 = vmor %vm184_vm8, %vm185_vm7 }
 0x1c7   :  { %v181_v52 = vsub.f32 1.0, %v180_v51 }
 0x1c9   :  { %v182_v54 = vmul.f32 %v327_v50, %v181_v52 }
 0x1cb   :  { %v183_v56 = vadd.f32 %v327_v50, %v182_v54 }
 0x1cd   :  { %v187_v58 = vsel %vm186_vm9, %v327_v50, %v183_v56 }
 0x1ce   :  { %v192_v59 = vsel %vm189_vm10, %v191_v57, %v187_v58 }
 0x1cf   :  { %v194_v60 = vmul.f32 0.7, %v192_v59 }
 0x1d1   :  { %v195_v62 = vadd.f32 0.001, %v194_v60 }
 0x1d3   :  { %v200_v63 = vmul.f32 %v198_v61, %v195_v62  ;;  %v203_v0 = vmul.f32 1.4265336, %v195_v62 }
 0x1d5   :  { %v201_v1 = vmul.f32 1.442695, %v200_v63  ;;  %328 = vlog2.f32 %v203_v0 }
 0x1d7   :  { %330 = vpow2.f32 %v201_v1 }
 0x1db   :  { %v329_v2 = vpop.eup %328 }
 0x1dc   :  { %v205_v3 = vmul.f32 0.6931472, %v329_v2 }
 0x1dd   :  { %v331_v4 = vpop.eup %330 }
 0x1de   :  { %215 = vrot.lane.b32.xlu1 %v331_v4, %s333_s0  ;;  %v206_v5 = vsub.f32 0.0, %v205_v3 }
 0x1e0   :  { %208 = vrot.lane.b32.xlu2 %v206_v5, %s333_s0 }
 0x23a   :  { %v209_v8 = vpop.permute.xlu2 %208 }
 0x23b   :  { %v211_v9 = vsel %vm126_vm5, %v209_v8, 0.0 }
 0x23c   :  { %212 = vadd.xlane.f32.xlu1 %v211_v9 }
 0x250   :  { %v216_v11 = vpop.permute.xlu1 %215 }
 0x251   :  { %v218_v12 = vmul.f32 %v216_v11, %v174_v10 }
 0x253   :  { %v219_v13 = vpack.c.bf16 %v218_v12, %v218_v12 }
 0x255   :  { %302 = vmatmul.msk.bf16.vlgmr.msra.gmra.mxu2 %vm157_vm6, %v219_v13 }
 0x2af   :  { %v213_v17 = vpop.xlane.xlu1 %212 }
 0x2b0   :  { %v259_v20 = vadd.f32 %v213_v17, %v129_v18 }
 0x2d8   :  { %v252_v19 = vpop.f32.mrf.mxu2 }
 0x2d9   :  { %v253_v21 = vadd.f32 %v315_v16, %v252_v19 }
 0x2db   :  { %v260_v22 = vsel %vm258_vm11, %v259_v20, %v253_v21 }
 0x2dc   :  { %261 = vst [vmem:[%s448_s9] sm:$0x3] %v260_v22 }
 0x2e0   :  { %v254_v23 = vpop.f32.mrf.mxu2 }

</bundles_post_ra>
